<compile_context>
chip_gen: v7x
topology: tpu7x:2x2x1
jax: 0.10.0
libtpu: 0.0.40
codegen_flags: <defaults>
</compile_context>

<pallas_src>
import functools

import jax
import jax.numpy as jnp
from jax import lax
from jax.experimental import pallas as pl
from jax.experimental.pallas import tpu as pltpu


def hamiltonian_kernel(x_ref, w1_ref, w2_ref, w3_ref, o_ref, *, act_dtype):
    """Fused forward, transposed activations (N on the lane axis).

    x:  (tile_n, in_dim)  natural-layout input tile
    w1: (inner, in_dim)   torch-layout weight of linear1
    w2: (inner, inner)    torch-layout weight of linear2
    w3: (inner, 1)        linear3 weight as an f32 column
    o:  (1, tile_n)       lane-dense output row
    """
    # h1^T = tanh(W1 @ x^T): contract in_dim of both operands on the MXU,
    # result is (inner, tile_n) with N on lanes.  f32 accumulation.
    z1 = lax.dot_general(
        w1_ref[...], x_ref[...],
        dimension_numbers=(((1,), (1,)), ((), ())),
        preferred_element_type=jnp.float32,
    )
    h1 = jnp.tanh(z1.astype(act_dtype))

    # h2^T = tanh(W2 @ h1^T).  When act_dtype == matmul dtype the astype is a
    # no-op (no extra VPU cast pass).
    z2 = jnp.dot(w2_ref[...], h1.astype(w2_ref.dtype),
                 preferred_element_type=jnp.float32)
    h2 = jnp.tanh(z2.astype(act_dtype))

    # out^T = tanh(W3 @ h2^T) as a VPU multiply + sublane reduce (output dim
    # is 1, an MXU matmul would waste >99% of the array).  w3 is f32, so the
    # product/reduction promote to f32 regardless of act_dtype.
    z3 = jnp.sum(h2 * w3_ref[...], axis=0, keepdims=True)
    o_ref[...] = jnp.tanh(z3).astype(o_ref.dtype)


def _round_up(a, b):
    return ((a + b - 1) // b) * b


def hamiltonian_forward(x, w1, w2, w3, *, tile_n=4096,
                        compute_dtype=jnp.bfloat16, activation_dtype=None):
    """Fused forward of the Hamiltonian module.

    x:  (..., in_dim)  -> output (N, 1) with N = prod(leading dims)
    w1: (inner, in_dim)   == nn.Linear(in_dim, inner, bias=False).weight
    w2: (inner, inner)    == nn.Linear(inner, inner, bias=False).weight
    w3: (1, inner)        == nn.Linear(inner, 1,     bias=False).weight
    compute_dtype:    dtype of the MXU operands (accumulation always f32).
    activation_dtype: dtype of the tanh chain (defaults to compute_dtype;
                      use jnp.float32 on v5e or for stricter accuracy).
    """
    if activation_dtype is None:
        activation_dtype = compute_dtype

    in_dim = w1.shape[1]
    inner = w1.shape[0]
    x2d = x.reshape(-1, in_dim)
    n = x2d.shape[0]

    # Lane-dense tiling of the point axis: >=128, multiple of 128, no larger
    # than needed for this N.
    tile_n = max(128, min(_round_up(tile_n, 128), _round_up(n, 128)))
    # v7x megacore: make sure the "parallel" grid axis has >=2 steps so both
    # TensorCores get work (one extra ~0.35us step is noise on v5e/v6e).
    if _round_up(n, tile_n) // tile_n < 2 and tile_n >= 256:
        tile_n = _round_up(tile_n // 2, 128)
    n_pad = _round_up(n, tile_n)

    # Cast once to the matmul operand dtype, then zero-pad rows.  Padded rows
    # stay exactly 0 through the bias-free tanh chain and are sliced off.
    xc = x2d.astype(compute_dtype)
    if n_pad != n:
        xc = jnp.pad(xc, ((0, n_pad - n), (0, 0)))

    w1c = w1.astype(compute_dtype)                     # (inner, in_dim)
    w2c = w2.astype(compute_dtype)                     # (inner, inner)
    w3col = jnp.transpose(w3).astype(jnp.float32)      # (inner, 1), f32 VPU

    grid = (n_pad // tile_n,)

    cost = pl.CostEstimate(
        flops=2 * n_pad * (in_dim * inner + inner * inner + inner),
        transcendentals=n_pad * (2 * inner + 1),
        bytes_accessed=(xc.size * xc.dtype.itemsize
                        + w1c.size * w1c.dtype.itemsize
                        + w2c.size * w2c.dtype.itemsize
                        + w3col.size * 4
                        + n_pad * 4),
    )

    kernel = functools.partial(hamiltonian_kernel, act_dtype=activation_dtype)

    out_t = pl.pallas_call(
        kernel,
        out_shape=jax.ShapeDtypeStruct((1, n_pad), jnp.float32),
        grid_spec=pltpu.PrefetchScalarGridSpec(
            num_scalar_prefetch=0,
            grid=grid,
            in_specs=[
                pl.BlockSpec((tile_n, in_dim), lambda i: (i, 0)),  # x tile
                pl.BlockSpec((inner, in_dim), lambda i: (0, 0)),   # W1 (full)
                pl.BlockSpec((inner, inner), lambda i: (0, 0)),    # W2 (full)
                pl.BlockSpec((inner, 1), lambda i: (0, 0)),        # W3 column
            ],
            out_specs=pl.BlockSpec((1, tile_n), lambda i: (0, i)),
        ),
        compiler_params=pltpu.CompilerParams(
            dimension_semantics=("parallel",),
        ),
        cost_estimate=cost,
    )(xc, w1c, w2c, w3col)

    # Back to the module's (N, 1) layout; drop padded columns.
    return out_t[0, :n].reshape(n, 1)


def make_params(key, in_dim, inner_dim):
    """Deterministic synthetic weights in torch nn.Linear layout (out, in)."""
    k1, k2, k3 = jax.random.split(key, 3)

    def linear_w(k, fan_in, fan_out):
        bound = 1.0 / jnp.sqrt(jnp.float32(fan_in))
        return jax.random.uniform(
            k, (fan_out, fan_in), jnp.float32, minval=-bound, maxval=bound
        )

    w1 = linear_w(k1, in_dim, inner_dim)      # (inner, in_dim)
    w2 = linear_w(k2, inner_dim, inner_dim)   # (inner, inner)
    w3 = linear_w(k3, inner_dim, 1)           # (1, inner)
    return w1, w2, w3


if __name__ == "__main__":
    in_dimension = 32
    inner_dimension = 32   # module default: inner_dimension = in_dimension
    n_points = 300         # non-multiple of 128 -> exercises padding + 2-step grid

    key = jax.random.PRNGKey(0)
    kx, kw = jax.random.split(key)
    x = jax.random.normal(kx, (n_points, in_dimension), jnp.float32)
    w1, w2, w3 = make_params(kw, in_dimension, inner_dimension)

    # Default fast path: bf16 MXU operands and bf16 tanh chain (v6e/v7x),
    # f32 accumulation.
    out = jax.block_until_ready(hamiltonian_forward(x, w1, w2, w3))

    # Strict-precision path (also what you'd run on v5e) for an exact check
    # against the torch forward.
    out_f32 = jax.block_until_ready(
        hamiltonian_forward(x, w1, w2, w3,
                            compute_dtype=jnp.float32,
                            activation_dtype=jnp.float32)
    )

    # Pure-JAX reference of the PyTorch module forward (torch weight layout).
    ref = jnp.tanh(jnp.tanh(jnp.tanh(x @ w1.T) @ w2.T) @ w3.T)

    assert out.shape == (n_points, 1)
    assert jnp.allclose(out_f32, ref, atol=1e-5, rtol=1e-5)
    assert jnp.allclose(out, ref, atol=5e-2, rtol=0.0)

    print("KERNEL_OK")
</pallas_src>

<mosaic_0001>
module attributes {stable_mosaic.version = 11 : i64} {
  func.func @hamiltonian_kernel(%arg0: i32, %arg1: memref<256x32xbf16, #tpu.memory_space<vmem>>, %arg2: memref<32x32xbf16, #tpu.memory_space<vmem>>, %arg3: memref<32x32xbf16, #tpu.memory_space<vmem>>, %arg4: memref<32x1xf32, #tpu.memory_space<vmem>>, %arg5: memref<1x256xf32, #tpu.memory_space<vmem>>) attributes {dimension_semantics = [#tpu.dimension_semantics<parallel>], iteration_bounds = array<i64: 2>, scalar_prefetch = 0 : i64, scratch_operands = 0 : i64, tpu.core_type = #tpu.core_type<tc>, window_params = [{transform_indices = @transform_0, window_bounds = array<i64: 256, 32>}, {pipeline_mode = #tpu.pipeline_mode<synchronous>, transform_indices = @transform_1, window_bounds = array<i64: 32, 32>}, {pipeline_mode = #tpu.pipeline_mode<synchronous>, transform_indices = @transform_2, window_bounds = array<i64: 32, 32>}, {pipeline_mode = #tpu.pipeline_mode<synchronous>, transform_indices = @transform_3, window_bounds = array<i64: 32, 1>}, {transform_indices = @transform_4, window_bounds = array<i64: 1, 256>}]} {
    %c0 = arith.constant 0 : index
    %c0_0 = arith.constant 0 : index
    %0 = vector.load %arg2[%c0, %c0_0] : memref<32x32xbf16, #tpu.memory_space<vmem>>, vector<32x32xbf16>
    %c0_1 = arith.constant 0 : index
    %c0_2 = arith.constant 0 : index
    %1 = vector.load %arg1[%c0_1, %c0_2] : memref<256x32xbf16, #tpu.memory_space<vmem>>, vector<256x32xbf16>
    %cst = arith.constant dense<0.000000e+00> : vector<32x256xf32>
    %2 = tpu.matmul %0, %1, %cst {dimension_numbers = #tpu.dot_dimension_numbers<[1], [1], [0], [0], [0, 0, 1, 0], [], []>} : vector<32x32xbf16>, vector<256x32xbf16>, vector<32x256xf32> -> vector<32x256xf32>
    %3 = arith.truncf %2 : vector<32x256xf32> to vector<32x256xbf16>
    %4 = math.tanh %3 : vector<32x256xbf16>
    %c0_3 = arith.constant 0 : index
    %c0_4 = arith.constant 0 : index
    %5 = vector.load %arg3[%c0_3, %c0_4] : memref<32x32xbf16, #tpu.memory_space<vmem>>, vector<32x32xbf16>
    %cst_5 = arith.constant dense<0.000000e+00> : vector<32x256xf32>
    %6 = tpu.matmul %5, %4, %cst_5 {dimension_numbers = #tpu.dot_dimension_numbers<[1], [0], [0], [1], [0, 0, 1, 1], [], []>} : vector<32x32xbf16>, vector<32x256xbf16>, vector<32x256xf32> -> vector<32x256xf32>
    %7 = arith.truncf %6 : vector<32x256xf32> to vector<32x256xbf16>
    %8 = math.tanh %7 : vector<32x256xbf16>
    %c0_6 = arith.constant 0 : index
    %c0_7 = arith.constant 0 : index
    %9 = vector.load %arg4[%c0_6, %c0_7] : memref<32x1xf32, #tpu.memory_space<vmem>>, vector<32x1xf32>
    %10 = arith.extf %8 : vector<32x256xbf16> to vector<32x256xf32>
    %11 = vector.broadcast %9 : vector<32x1xf32> to vector<32x256xf32>
    %12 = arith.mulf %10, %11 : vector<32x256xf32>
    %cst_8 = arith.constant dense<0.000000e+00> : vector<256xf32>
    %13 = vector.multi_reduction <add>, %12, %cst_8 [0] : vector<32x256xf32> to vector<256xf32>
    %14 = vector.shape_cast %13 : vector<256xf32> to vector<1x256xf32>
    %15 = math.tanh %14 : vector<1x256xf32>
    %c0_9 = arith.constant 0 : index
    %c0_10 = arith.constant 0 : index
    %16 = vector.load %arg5[%c0_9, %c0_10] : memref<1x256xf32, #tpu.memory_space<vmem>>, vector<1x256xf32>
    tpu.vector_store %arg5[%c0_9, %c0_10], %15 {strides = array<i32>} : memref<1x256xf32, #tpu.memory_space<vmem>>, vector<1x256xf32>,
    return
  }
  func.func @transform_0(%arg0: i32) -> (i32, i32) {
    %c0_i32 = arith.constant 0 : i32
    %c0_i32_0 = arith.constant 0 : i32
    return %arg0, %c0_i32 : i32, i32
  }
  func.func @transform_1(%arg0: i32) -> (i32, i32) {
    %c0_i32 = arith.constant 0 : i32
    %c0_i32_0 = arith.constant 0 : i32
    %c0_i32_1 = arith.constant 0 : i32
    return %c0_i32, %c0_i32_0 : i32, i32
  }
  func.func @transform_2(%arg0: i32) -> (i32, i32) {
    %c0_i32 = arith.constant 0 : i32
    %c0_i32_0 = arith.constant 0 : i32
    %c0_i32_1 = arith.constant 0 : i32
    return %c0_i32, %c0_i32_0 : i32, i32
  }
  func.func @transform_3(%arg0: i32) -> (i32, i32) {
    %c0_i32 = arith.constant 0 : i32
    %c0_i32_0 = arith.constant 0 : i32
    %c0_i32_1 = arith.constant 0 : i32
    return %c0_i32, %c0_i32_0 : i32, i32
  }
  func.func @transform_4(%arg0: i32) -> (i32, i32) {
    %c0_i32 = arith.constant 0 : i32
    %c0_i32_0 = arith.constant 0 : i32
    return %c0_i32, %arg0 : i32, i32
  }
}

</mosaic_0001>

<bundles_post_ra>
// kernel: tpu_custom_call.1
= control target key start
LH: loop header
LB: loop body
LE: loop exit
PB: predicated region body
PF: predicated region fallthrough
CT: control target
= control target key end

     0   :  { %9 = vsyncpa [#allocation3], 0  ;;  %s1083_s0 = inlined_call_operand.vmem [shape: bf16[512,32], index: 0, kind: input, shape index: {}]   ;;  %s1084_s1 = inlined_call_operand.vmem [shape: bf16[32,32], index: 1, kind: input, shape index: {}]   ;;  %s1085_s2 = inlined_call_operand.vmem [shape: bf16[32,32], index: 2, kind: input, shape index: {}]   ;;  %s1086_s3 = inlined_call_operand.vmem [shape: f32[32,1], index: 3, kind: input, shape index: {}]   ;;  %s1087_s4 = inlined_call_operand.hbm [shape: f32[1,512], index: 4, kind: output, shape index: {}]  }
   0x1   :  { %11 = vsyncpa [#allocation3 + $0x1], 0  ;;  %s920_s15 = smov 0   ;;  %s922_s16 = smov 0  }
   0x2   :  { %s924_s17 = smov 0   ;;  %s926_s18 = smov 0  }
   0x3 LB: > { %s679_s19 = sadd.s32 4294967295, %s890_s18   ;;  %s680_s20 = sadd.s32 4294967294, %s890_s18   ;;  %s890_s18 = sphi %s926_s18, %s1093_s18   ;;  %s886_s17 = sphi %s924_s17, %s1092_s17   ;;  %s882_s16 = sphi %s922_s16, %s1091_s16   ;;  %s878_s15 = sphi %s920_s15, %s1090_s15  }
   0x4   : > { %s943_s21 = sadd.s32 1, %s890_s18   ;;  %s113_s22 = sadd.s32 1, %s886_s17 }
   0x5   : > { %s110_s23 = ssub.s32 %s890_s18, %s943_s21  ;;  %p123_p0 = scmp.ne.s32.totalorder %s886_s17, %s882_s16 }
   0x6   : > { %p111_p1 = scmp.eq.s32.totalorder %s110_s23, 0  ;;  %p124_p2 = scmp.eq.s32.totalorder %s679_s19, 1 }
   0x7   : > { %p129_p3 = scmp.ne.s32.totalorder %s882_s16, %s878_s15  ;;  %p130_p4 = scmp.eq.s32.totalorder %s680_s20, 1 }
   0x8   : > { %s953_s24 = scalar_select %p111_p1, %s886_s17, %s113_s22  }
   0x9   : > { %p955_p5 = por %p124_p2, %p123_p0  ;;  %p959_p6 = por %p130_p4, %p129_p3 }
   0xa   : > { %p683_p7 = scmp.ge.s32.totalorder %s890_s18, 1  ;;  %p166_p8 = scmp.lt.s32.totalorder %s890_s18, 3 }
   0xc   : > { %p167_p9 = pnand %p683_p7, %p166_p8 }
   0xd   : > { %s965_s27 = sshll.u32 (!%p167_p9), %s679_s19, 5  ;;  %v804_v0 = vld [vmem:[%s1084_s1] sm:$0xff] (!%p167_p9)   ;;  %vm326_vm0 = vcmask (!%p167_p9), 261120   ;;  %v805_v25 = vld [vmem:[%s1084_s1 + $0x8] sm:$0xff] (!%p167_p9)   ;;  %v892_v26 = vmov (!%p167_p9), 0   ;;  %v525_v28 = vld [vmem:[%s1086_s3 + $0x10] sm:$0xff] (!%p167_p9) }
   0xe   : > { %170 = sbr.rel (%p167_p9) target bundleno = 620 (0x26c), region = 36  ;;  %p193_p10 = scmp.lt.s32.totalorder (!%p167_p9), %s965_s27, 63  ;;  %733 = vmatprep.mubr.msk.bf16.mxu0 (!%p167_p9), %vm326_vm0, %v804_v0  ;;  %494 = vmatprep.mubr.bf16.mxu1 (!%p167_p9), %v892_v26  ;;  %v523_v27 = vld [vmem:[%s1086_s3] sm:$0xff] (!%p167_p9)  ;;  %v524_v29 = vld [vmem:[%s1086_s3 + $0x8] sm:$0xff] (!%p167_p9)  ;;  %v526_v30 = vld [vmem:[%s1086_s3 + $0x18] sm:$0xff] (!%p167_p9) }
   0xf   : > { %786 = vset.pattern.permute.xlu0 (!%p167_p9), %v892_v26  ;;  %787 = vset.pattern.permute.xlu1 (!%p167_p9), %v892_v26  ;;  %v806_v47 = vld [vmem:[%s1085_s2] sm:$0xff] (!%p167_p9)   ;;  %v807_v48 = vld [vmem:[%s1085_s2 + $0x8] sm:$0xff] (!%p167_p9)   ;;  %s189_s6 = sand.u32 (!%p167_p9), 1, %s882_s16   ;;  %s1041_s12 = scalar_lea.hbm (!%p167_p9), %s1087_s4, %s965_s27 }
  0x10   : > { %537 = vperm.xlu0 (!%p167_p9), %786, %v523_v27   ;;  %547 = vperm.xlu1 (!%p167_p9), %787, %v525_v28   ;;  %s684_s7 = sshll.u32 (!%p167_p9), %s189_s6, 1  ;;  %s607_s13 = scalar_lea.sflag (!%p167_p9), [#allocation3], %s189_s6 }
  0x11   : > { %s894_s19 = smov (!%p167_p9), [#allocation2]  }
  0x12   : > { %s832_s20 = sshll.u32 (!%p167_p9), %s894_s19, 4  ;;  %s833_s20 = int_to_ptr.vmem [resolvable:$false] %s832_s20 }
  0x13   : > { %s834_s22 = scalar_lea.vmem (!%p167_p9), %s833_s20, 64 }
  0x14   : > { %542 = vperm.xlu0 (!%p167_p9), %786, %v524_v29   ;;  %552 = vperm.xlu1 (!%p167_p9), %787, %v526_v30  }
  0x15   : > { %s194_s30 = scalar_select %p193_p10, %s965_s27, 63 }
  0x17   : > { %s686_s5 = sshll.u32 %s194_s30, 2 }
  0x18   : > { %s976_s8 = scalar_lea.vmem %s1083_s0, %s686_s5 }
  0x19   : > { %v788_v1 = vld [vmem:[%s976_s8 + $0x40] sm:$0xff]   ;;  %v790_v3 = vld [vmem:[%s976_s8 + $0x48] sm:$0xff]   ;;  %v792_v7 = vld [vmem:[%s976_s8 + $0x50] sm:$0xff]  }
  0x1a   : > { %v789_v2 = vld [vmem:[%s976_s8] sm:$0xff]   ;;  %737 = vmatprep.subr.msk.bf16.mxu0 %vm326_vm0, %v788_v1  ;;  %v791_v5 = vld [vmem:[%s976_s8 + $0x8] sm:$0xff]   ;;  %v793_v8 = vld [vmem:[%s976_s8 + $0x10] sm:$0xff]  }
  0x1b   : > { %v334_v4 = vsel %vm326_vm0, %v789_v2, 0  ;;  %v337_v6 = vsel %vm326_vm0, %v791_v5, 0  ;;  %v340_v9 = vsel %vm326_vm0, %v793_v8, 0  ;;  %v794_v10 = vld [vmem:[%s976_s8 + $0x58] sm:$0xff]   ;;  %v796_v13 = vld [vmem:[%s976_s8 + $0x60] sm:$0xff]   ;;  %v798_v16 = vld [vmem:[%s976_s8 + $0x68] sm:$0xff]  }
  0x1c   : > { %718 = vmatpush3.bf16.xpose.msra.mxu0 %v334_v4  ;;  %v795_v11 = vld [vmem:[%s976_s8 + $0x18] sm:$0xff]   ;;  %v797_v14 = vld [vmem:[%s976_s8 + $0x20] sm:$0xff]   ;;  %v799_v17 = vld [vmem:[%s976_s8 + $0x28] sm:$0xff]  }
  0x1d   : > { %738 = vmatprep.subr.msk.bf16.mxu0 %vm326_vm0, %v790_v3  ;;  %v343_v12 = vsel %vm326_vm0, %v795_v11, 0  ;;  %v346_v15 = vsel %vm326_vm0, %v797_v14, 0  ;;  %v349_v18 = vsel %vm326_vm0, %v799_v17, 0  ;;  %v800_v19 = vld [vmem:[%s976_s8 + $0x70] sm:$0xff]   ;;  %v802_v22 = vld [vmem:[%s976_s8 + $0x78] sm:$0xff]  }
  0x1e   : > { %v801_v20 = vld [vmem:[%s976_s8 + $0x30] sm:$0xff]   ;;  %v803_v23 = vld [vmem:[%s976_s8 + $0x38] sm:$0xff]   ;;  %s191_s8 = scalar_lea.vmem [#allocation2], %s684_s7 }
  0x1f   : > { %v352_v21 = vsel %vm326_vm0, %v801_v20, 0  ;;  %v355_v24 = vsel %vm326_vm0, %v803_v23, 0  ;;  %s621_s9 = sshll.u32 %s191_s8, 4  ;;  %s1043_s9 = int_to_ptr.vmem [resolvable:$true] %s621_s9 }
  0x20   : > { %s828_s14 = scalar_lea.vmem %s1043_s9, 32  ;;  %p835_p0 = scmp.lt.s32.totalorder %s1043_s9, %s833_s20 }
  0x21   : > { %p829_p11 = scmp.ne.s32.totalorder %s1043_s9, %s828_s14  ;;  %p836_p1 = scmp.lt.s32.totalorder %s834_s22, %s828_s14 }
  0x23   : > { %p830_p12 = pnand %p829_p11, %p955_p5  ;;  %p837_p2 = por %p836_p1, %p835_p0 }
  0x24   : > { %720 = vmatpush3.bf16.xpose.msra.mxu0 %v337_v6 }
  0x25   : > { %739 = vmatprep.subr.msk.bf16.mxu0 %vm326_vm0, %v792_v7  ;;  %p831_p13 = pneg %p830_p12 }
  0x27   : > { %p838_p3 = pnand %p837_p2, %p831_p13 }
  0x2c   : > { %722 = vmatpush3.bf16.xpose.msra.mxu0 %v340_v9 }
  0x2d   : > { %740 = vmatprep.subr.msk.bf16.mxu0 %vm326_vm0, %v794_v10 }
  0x34   : > { %724 = vmatpush3.bf16.xpose.msra.mxu0 %v343_v12 }
  0x35   : > { %741 = vmatprep.subr.msk.bf16.mxu0 %vm326_vm0, %v796_v13 }
  0x3c   : > { %726 = vmatpush3.bf16.xpose.msra.mxu0 %v346_v15 }
  0x3d   : > { %742 = vmatprep.subr.msk.bf16.mxu0 %vm326_vm0, %v798_v16 }
  0x44   : > { %728 = vmatpush3.bf16.xpose.msra.mxu0 %v349_v18 }
  0x45   : > { %743 = vmatprep.subr.msk.bf16.mxu0 %vm326_vm0, %v800_v19 }
  0x4c   : > { %730 = vmatpush3.bf16.xpose.msra.mxu0 %v352_v21 }
  0x4d   : > { %744 = vmatprep.subr.msk.bf16.mxu0 %vm326_vm0, %v802_v22 }
  0x54   : > { %732 = vmatpush3.bf16.xpose.msra.mxu0 %v355_v24 }
  0x5b   : > { %734 = vmatmul.mubr.msk.bf16.vlgmr.msra.gmra.mrb[0].mxu0 %vm326_vm0, %v804_v0 }
  0x5c   : > { %735 = vmatprep.mubr.msk.bf16.mxu0 %vm326_vm0, %v805_v25 }
  0x63   : > { %736 = vmatmul.mubr.msk.bf16.gmra.mrb[4].mxu0 %vm326_vm0, %v805_v25 }
  0x8f   : > { %v538_v61 = vpop.permute.xlu0 %537  ;;  %v548_v5 = vpop.permute.xlu1 %547 }
  0x93   : > { %v543_v3 = vpop.permute.xlu0 %542  ;;  %v553_v15 = vpop.permute.xlu1 %552 }
 0x12e   : > { %v415_v31 = vpop.f32.mrb[0].mxu0 }
 0x12f   : > { %v417_v32 = vpop.f32.mrb[1].mxu0 }
 0x130   : > { %v419_v33 = vpop.f32.mrb[2].mxu0 }
 0x131   : > { %v434_v34 = vpack.c.bf16 %v419_v33, %v415_v31  ;;  %v421_v35 = vpop.f32.mrb[3].mxu0 }
 0x132   : > { %v435_v36 = vpack.c.bf16 %v421_v35, %v417_v32 }
 0x134   : > { %808 = vtanh.bf16 %v435_v36 }
 0x135   : > { %810 = vtanh.bf16 %v434_v34 }
 0x136   : > { %v425_v37 = vpop.f32.mrb[4].mxu0 }
 0x137   : > { %v427_v38 = vpop.f32.mrb[5].mxu0 }
 0x138   : > { %v429_v39 = vpop.f32.mrb[6].mxu0 }
 0x139   : > { %v436_v40 = vpack.c.bf16 %v429_v39, %v425_v37  ;;  %v431_v41 = vpop.f32.mrb[7].mxu0  ;;  %v893_v39 = vmov 1966171168  }
 0x13a   : > { %v437_v42 = vpack.c.bf16 %v431_v41, %v427_v38  ;;  %v589_v41 = vlaneseq }
 0x13c   : > { %812 = vtanh.bf16 %v437_v42  ;;  %vm603_vm1 = vcmp.lt.s32.totalorder %v589_v41, 256 }
 0x13d   : > { %814 = vtanh.bf16 %v436_v40  ;;  %v587_v40 = vunpack.c.l.s4 %v893_v39 }
 0x13f   : > { %v809_v43 = vpop.eup %808  ;;  %v588_v42 = vunpack.c.0.s8 %v587_v40 }
 0x140   : > { %v811_v44 = vpop.eup %810  ;;  %462 = vmatprep.subr.bf16.mxu1 %v809_v43  ;;  %v590_v43 = vshrl.u32 %v589_v41, 7 }
 0x141   : > { %463 = vmatpush1.bf16.msra.mxu1 %v811_v44 }
 0x147   : > { %v813_v45 = vpop.eup %812 }
 0x148   : > { %v815_v46 = vpop.eup %814  ;;  %464 = vmatprep.subr.bf16.mxu1 %v813_v45  ;;  %v591_v45 = vsub.s32 %v588_v42, %v590_v43 }
 0x149   : > { %465 = vmatpush1.bf16.msra.mxu1 %v815_v46 }
 0x14c   : > { %709 = vmatmul.mubr.msk.bf16.vlgmr.msra.gmra.mrb[0].mxu1 %vm326_vm0, %v806_v47 }
 0x14d   : > { %504 = vmatprep.mubr.bf16.mxu1 %v892_v26 }
 0x154   : > { %710 = vmatmul.mubr.msk.bf16.gmra.mrb[4].mxu1 %vm326_vm0, %v807_v48 }
 0x21f   : > { %v496_v49 = vpop.f32.mrb[0].mxu1 }
 0x220   : > { %v498_v50 = vpop.f32.mrb[1].mxu1 }
 0x221   : > { %v500_v51 = vpop.f32.mrb[2].mxu1 }
 0x222   : > { %v515_v52 = vpack.c.bf16 %v500_v51, %v496_v49  ;;  %v502_v53 = vpop.f32.mrb[3].mxu1 }
 0x223   : > { %v516_v54 = vpack.c.bf16 %v502_v53, %v498_v50 }
 0x224   : > { %816 = vtanh.bf16 %v515_v52 }
 0x225   : > { %818 = vtanh.bf16 %v516_v54 }
 0x227   : > { %v506_v55 = vpop.f32.mrb[4].mxu1 }
 0x228   : > { %v508_v56 = vpop.f32.mrb[5].mxu1 }
 0x229   : > { %v510_v57 = vpop.f32.mrb[6].mxu1 }
 0x22a   : > { %v517_v58 = vpack.c.bf16 %v510_v57, %v506_v55  ;;  %v512_v59 = vpop.f32.mrb[7].mxu1 }
 0x22b   : > { %v518_v60 = vpack.c.bf16 %v512_v59, %v508_v56 }
 0x22c   : > { %820 = vtanh.bf16 %v517_v58 }
 0x22d   : > { %822 = vtanh.bf16 %v518_v60 }
 0x22f   : > { %v817_v62 = vpop.eup %816 }
 0x230   : > { %v819_v63 = vpop.eup %818  ;;  %v527_v0 = vunpack.c.l.bf16 %v817_v62  ;;  %v529_v1 = vunpack.c.h.bf16 %v817_v62 }
 0x231   : > { %v528_v2 = vunpack.c.l.bf16 %v819_v63  ;;  %v530_v4 = vunpack.c.h.bf16 %v819_v63 }
 0x232   : > { %v555_v6 = vmul.f32 %v538_v61, %v527_v0  ;;  %v557_v7 = vmul.f32 %v543_v3, %v529_v1 }
 0x233   : > { %v556_v9 = vmul.f32 %v538_v61, %v528_v2  ;;  %v558_v10 = vmul.f32 %v543_v3, %v530_v4 }
 0x234   : > { %v563_v17 = vadd.f32 %v557_v7, %v555_v6 }
 0x235   : > { %v572_v19 = vadd.f32 %v558_v10, %v556_v9 }
 0x237   : > { %v821_v8 = vpop.eup %820 }
 0x238   : > { %v823_v11 = vpop.eup %822  ;;  %v531_v12 = vunpack.c.l.bf16 %v821_v8  ;;  %v533_v13 = vunpack.c.h.bf16 %v821_v8 }
 0x239   : > { %v532_v14 = vunpack.c.l.bf16 %v823_v11  ;;  %v534_v16 = vunpack.c.h.bf16 %v823_v11 }
 0x23a   : > { %v559_v18 = vmul.f32 %v548_v5, %v531_v12  ;;  %v561_v22 = vmul.f32 %v553_v15, %v533_v13 }
 0x23b   : > { %v560_v20 = vmul.f32 %v548_v5, %v532_v14  ;;  %v562_v24 = vmul.f32 %v553_v15, %v534_v16 }
 0x23c   : > { %v564_v21 = vadd.f32 %v563_v17, %v559_v18 }
 0x23d   : > { %v573_v23 = vadd.f32 %v572_v19, %v560_v20 }
 0x23e   : > { %v565_v25 = vadd.f32 %v564_v21, %v561_v22 }
 0x23f   : > { %v574_v26 = vadd.f32 %v573_v23, %v562_v24 }
 0x240   : > { %v566_v27 = vrot.slane %v565_v25, 4 }
 0x241   : > { %v575_v28 = vrot.slane %v574_v26, 4 }
 0x242   : > { %v567_v29 = vadd.f32 %v566_v27, %v565_v25 }
 0x243   : > { %v576_v30 = vadd.f32 %v575_v28, %v574_v26 }
 0x244   : > { %v568_v31 = vrot.slane %v567_v29, 2 }
 0x245   : > { %v577_v32 = vrot.slane %v576_v30, 2 }
 0x246   : > { %v569_v33 = vadd.f32 %v568_v31, %v567_v29 }
 0x247   : > { %v578_v34 = vadd.f32 %v577_v32, %v576_v30 }
 0x248   : > { %v570_v35 = vrot.slane %v569_v33, 1 }
 0x249   : > { %v579_v36 = vrot.slane %v578_v34, 1 }
 0x24a   : > { %v571_v37 = vadd.f32 %v570_v35, %v569_v33 }
 0x24b   : > { %v580_v38 = vadd.f32 %v579_v36, %v578_v34 }
 0x24c   : > { %824 = vtanh.f32 %v571_v37 }
 0x24d   : > { %826 = vtanh.f32 %v580_v38 }
 0x256   : > { %v825_v44 = vpop.eup %824 }
 0x257   : > { %v827_v46 = vpop.eup %826 }
 0x258   : > { %v585_v47 = vcombine.low %v825_v44, %v827_v46 }
 0x25a   : > { %v592_v48 = vrot.slane %v585_v47, %v591_v45 }
 0x25c   : > { %v599_v49 = vrot.slane %v592_v48, %v591_v45 }
 0x25e   : > { %605 = vst.msk [vmem:[%s191_s8] sm:$0x3] %vm603_vm1, %v599_v49 }
 0x25f   : > { %841 = shalt.err (!%p838_p3)
}
 0x260   : > { %s842_s27 = scalar_lea.hbm %s1041_s12, 32  ;;  %s846_s29 = scalar_lea.hbm %s1087_s4, 64 }
 0x261   : > { %p843_p4 = scmp.ne.s32.totalorder %s1041_s12, %s842_s27  ;;  %p847_p9 = scmp.lt.u32.totalorder %s1041_s12, %s1087_s4 }
 0x262   : > { %p848_p10 = scmp.lt.u32.totalorder %s846_s29, %s842_s27  ;;  %p850_p12 = scmp.lt.u32.totalorder %s842_s27, %s1041_s12 }
 0x263   : > { %p844_p7 = pnand %p843_p4, %p955_p5 }
 0x264   : > { %p849_p11 = por %p848_p10, %p847_p9 }
 0x265   : > { %p845_p8 = pneg %p844_p7 }
 0x266   : > { %p851_p13 = por %p850_p12, %p849_p11 }
 0x268   : > { %p852_p0 = pnand %p851_p13, %p845_p8 }
 0x26a   : > { %855 = shalt.err (!%p852_p0)
}
 0x26b   : > { %745 = dma.vmem_to_hbm [thread:$0]  (%p955_p5), %s1043_s9, 32, %s1041_s12, %s607_s13  }
 0x26c PF: > { %p751_p1 = scmp.ge.s32.totalorder %s890_s18, 2  ;;  %s633_s6 = sand.u32 1, %s878_s15  }
 0x26d   : > { %s634_s7 = scalar_lea.sflag [#allocation3], %s633_s6 }
 0x26e   : > { %p748_p2 = pnand %p751_p1, %p959_p6 }
 0x270   : > { %873 = dma.done.wait (!%p748_p2), %s634_s7, 32  }
 0x271   : > { %875 = vsyncadd (!%p748_p2), %s634_s7, 4294967264  ;;  %p14_p3 = scmp.ge.s32.totalorder %s943_s21, 4   ;;  %s1090_s15 = smov %s882_s16 }
 0x272   : > { %s1091_s16 = smov %s886_s17  ;;  %s1092_s17 = smov %s953_s24 }
 0x273   : > { %s1093_s18 = smov %s943_s21  ;;  %16 = sbr.rel (!%p14_p3) target bundleno = 3 (0x3), region = 71 }
 0x27a   :  { %639 = vsyncpa [#allocation3], 1 }
 0x27b   :  { %641 = vsyncpa [#allocation3 + $0x1], 1 }

</bundles_post_ra>
